<compile_context>
chip_gen: v7x
topology: tpu7x:2x2x1
jax: 0.10.0
libtpu: 0.0.40
codegen_flags: <defaults>
</compile_context>

<pallas_src>
import functools

import jax
import jax.numpy as jnp
from jax.experimental import pallas as pl
from jax.experimental.pallas import tpu as pltpu


def _round_up(x, m):
    return ((x + m - 1) // m) * m


def _mlp_kernel(x_ref, w0_ref, b0_ref, wh_ref, bh_ref, wo_ref, bo_ref,
                out_ref, h_ref):
    """One (batch_tile, layer) grid step.

    grid = (num_batch_tiles, n_hidden_layers). The layer axis is sequential
    ("arbitrary") and carries the activation in the VMEM scratch `h_ref`.
    Weight/bias blocks for the input/output heads use constant index_maps so
    they stay VMEM-resident; wh/bh stream one layer tile per step.
    """
    l = pl.program_id(1)

    # ---- input layer (first layer step of each batch tile): Linear + ReLU ----
    @pl.when(l == 0)
    def _():
        h0 = jnp.dot(x_ref[...].astype(jnp.bfloat16), w0_ref[...],
                     preferred_element_type=jnp.float32)
        h_ref[...] = jnp.maximum(h0 + b0_ref[...], 0.0)

    # ---- hidden layer l: Linear + Dropout(identity at p=0 / eval) + ReLU ----
    # TODO(synk): nn.Dropout with p>0 in training mode would need PRNG masking;
    # here it is the identity (inference / p=0), matching the torch forward.
    hl = jnp.dot(h_ref[...].astype(jnp.bfloat16), wh_ref[0],
                 preferred_element_type=jnp.float32)
    h_ref[...] = jnp.maximum(hl + bh_ref[0], 0.0)

    # ---- output head (last layer step): Linear, no activation ----
    @pl.when(l == pl.num_programs(1) - 1)
    def _():
        logits = jnp.dot(h_ref[...].astype(jnp.bfloat16), wo_ref[...],
                         preferred_element_type=jnp.float32) + bo_ref[...]
        out_ref[...] = logits.astype(out_ref.dtype)


@jax.jit
def nn_classifier_forward(x, w0, b0, wh, bh, wo, bo):
    """Returns logits with torch's .squeeze() applied.

    Weights are expected pre-transposed as (in_features, out_features);
    wh / bh are stacked over layers: (L, H, H) / (L, 1, H).
    """
    B, in_size = x.shape
    hidden = w0.shape[1]
    n_layers = wh.shape[0]
    out_size = wo.shape[1]
    # TODO(synk): n_linear_layers == 0 would need a separate no-hidden-layer path.

    # --- padded sizes: lane dims to multiples of 128, batch to multiple of 8 ---
    IN_P = _round_up(in_size, 128)
    H_P = _round_up(hidden, 128)
    OUT_P = _round_up(out_size, 128)

    B8 = _round_up(B, 8)
    TILE_B = 256 if B8 >= 256 else B8          # MXU-friendly batch tile
    B_P = _round_up(B, TILE_B)

    f32, bf16 = jnp.float32, jnp.bfloat16

    # --- zero-pad inputs / params (exact: zero pads contribute nothing) ---
    x_p = jnp.zeros((B_P, IN_P), f32).at[:B, :in_size].set(x.astype(f32))
    w0_p = jnp.zeros((IN_P, H_P), bf16).at[:in_size, :hidden].set(w0.astype(bf16))
    b0_p = jnp.zeros((1, H_P), f32).at[:, :hidden].set(b0.reshape(1, hidden))
    wh_p = jnp.zeros((n_layers, H_P, H_P), bf16).at[:, :hidden, :hidden].set(
        wh.astype(bf16))
    bh_p = jnp.zeros((n_layers, 1, H_P), f32).at[:, :, :hidden].set(
        bh.reshape(n_layers, 1, hidden))
    wo_p = jnp.zeros((H_P, OUT_P), bf16).at[:hidden, :out_size].set(wo.astype(bf16))
    bo_p = jnp.zeros((1, OUT_P), f32).at[:, :out_size].set(bo.reshape(1, out_size))

    # --- VMEM budget: resident heads + double-buffered layer tile + act tiles ---
    resident_bytes = (
        IN_P * H_P * 2                       # w0 (bf16, resident)
        + H_P * OUT_P * 2                    # wo (bf16, resident)
        + 2 * H_P * H_P * 2                  # wh layer tile, double-buffered
        + (H_P + 2 * H_P + OUT_P) * 4        # b0, bh (x2), bo (f32)
        + 2 * TILE_B * IN_P * 4              # x tile, double-buffered
        + 2 * TILE_B * OUT_P * 4             # out tile, double-buffered
        + TILE_B * H_P * 4                   # h scratch
    )
    vmem_limit = int(min(max(2 * resident_bytes, 16 * 2**20), 56 * 2**20))

    grid = (B_P // TILE_B, n_layers)

    logits_p = pl.pallas_call(
        _mlp_kernel,
        out_shape=jax.ShapeDtypeStruct((B_P, OUT_P), f32),
        grid=grid,
        in_specs=[
            pl.BlockSpec((TILE_B, IN_P), lambda i, l: (i, 0)),      # x
            pl.BlockSpec((IN_P, H_P), lambda i, l: (0, 0)),         # w0 (resident)
            pl.BlockSpec((1, H_P), lambda i, l: (0, 0)),            # b0 (resident)
            pl.BlockSpec((1, H_P, H_P), lambda i, l: (l, 0, 0)),    # wh (streamed)
            pl.BlockSpec((1, 1, H_P), lambda i, l: (l, 0, 0)),      # bh (streamed)
            pl.BlockSpec((H_P, OUT_P), lambda i, l: (0, 0)),        # wo (resident)
            pl.BlockSpec((1, OUT_P), lambda i, l: (0, 0)),          # bo (resident)
        ],
        out_specs=pl.BlockSpec((TILE_B, OUT_P), lambda i, l: (i, 0)),
        scratch_shapes=[pltpu.VMEM((TILE_B, H_P), f32)],            # carried h
        compiler_params=pltpu.CompilerParams(
            dimension_semantics=("parallel", "arbitrary"),
            vmem_limit_bytes=vmem_limit,
        ),
    )(x_p, w0_p, b0_p, wh_p, bh_p, wo_p, bo_p)

    # strip padding, then torch: self.output_layer(activation).squeeze()
    return jnp.squeeze(logits_p[:B, :out_size])


def init_params(key, input_size, hidden_size, n_linear_layers, output_size):
    """Deterministic init mimicking torch.nn.Linear (U[-1/sqrt(fan_in), 1/sqrt(fan_in)]).

    Weights stored pre-transposed as (in_features, out_features), f32.
    """
    keys = jax.random.split(key, 6)

    def uni(k, shape, fan_in):
        bound = 1.0 / jnp.sqrt(jnp.float32(fan_in))
        return jax.random.uniform(k, shape, jnp.float32, -bound, bound)

    w0 = uni(keys[0], (input_size, hidden_size), input_size)
    b0 = uni(keys[1], (1, hidden_size), input_size)
    wh = uni(keys[2], (n_linear_layers, hidden_size, hidden_size), hidden_size)
    bh = uni(keys[3], (n_linear_layers, 1, hidden_size), hidden_size)
    wo = uni(keys[4], (hidden_size, output_size), hidden_size)
    bo = uni(keys[5], (1, output_size), hidden_size)
    return w0, b0, wh, bh, wo, bo


if __name__ == "__main__":
    # Small shapes consistent with the module defaults: batch=8, input_size=32,
    # hidden_size=64, n_linear_layers=1, output_size=1.
    B, INPUT, HIDDEN, N_LAYERS, OUT = 8, 32, 64, 1, 1

    key = jax.random.PRNGKey(0)
    kx, kp = jax.random.split(key)
    x = jax.random.normal(kx, (B, INPUT), jnp.float32)
    params = init_params(kp, INPUT, HIDDEN, N_LAYERS, OUT)

    logits = nn_classifier_forward(x, *params)
    logits = jax.block_until_ready(logits)

    # Pure-JAX f32 reference of the same forward pass.
    w0, b0, wh, bh, wo, bo = params
    h = jnp.maximum(x @ w0 + b0, 0.0)
    for l in range(N_LAYERS):
        h = jnp.maximum(h @ wh[l] + bh[l], 0.0)
    ref = jnp.squeeze(h @ wo + bo)

    assert logits.shape == (B,), logits.shape
    # bf16 matmul operands -> loosened tolerance vs f32 reference.
    assert jnp.allclose(logits, ref, atol=5e-2, rtol=5e-2), (logits, ref)

    print("KERNEL_OK")
</pallas_src>

<mosaic_0001>
module attributes {stable_mosaic.version = 11 : i64} {
  func.func @_mlp_kernel(%arg0: i32, %arg1: i32, %arg2: memref<8x128xf32, #tpu.memory_space<vmem>>, %arg3: memref<128x128xbf16, #tpu.memory_space<vmem>>, %arg4: memref<1x128xf32, #tpu.memory_space<vmem>>, %arg5: memref<1x128x128xbf16, #tpu.memory_space<vmem>>, %arg6: memref<1x1x128xf32, #tpu.memory_space<vmem>>, %arg7: memref<128x128xbf16, #tpu.memory_space<vmem>>, %arg8: memref<1x128xf32, #tpu.memory_space<vmem>>, %arg9: memref<8x128xf32, #tpu.memory_space<vmem>>, %arg10: memref<8x128xf32, #tpu.memory_space<vmem>>) attributes {dimension_semantics = [#tpu.dimension_semantics<parallel>, #tpu.dimension_semantics<arbitrary>], iteration_bounds = array<i64: 1, 1>, scalar_prefetch = 0 : i64, scratch_operands = 1 : i64, tpu.core_type = #tpu.core_type<tc>, window_params = [{transform_indices = @transform_0, window_bounds = array<i64: 8, 128>}, {pipeline_mode = #tpu.pipeline_mode<synchronous>, transform_indices = @transform_1, window_bounds = array<i64: 128, 128>}, {pipeline_mode = #tpu.pipeline_mode<synchronous>, transform_indices = @transform_2, window_bounds = array<i64: 1, 128>}, {transform_indices = @transform_3, window_bounds = array<i64: 1, 128, 128>}, {transform_indices = @transform_4, window_bounds = array<i64: 1, 1, 128>}, {pipeline_mode = #tpu.pipeline_mode<synchronous>, transform_indices = @transform_5, window_bounds = array<i64: 128, 128>}, {pipeline_mode = #tpu.pipeline_mode<synchronous>, transform_indices = @transform_6, window_bounds = array<i64: 1, 128>}, {transform_indices = @transform_7, window_bounds = array<i64: 8, 128>}]} {
    %c0_i32 = arith.constant 0 : i32
    %0 = arith.cmpi eq, %arg1, %c0_i32 : i32
    %1 = arith.extui %0 : i1 to i32
    %c0_i32_0 = arith.constant 0 : i32
    %2 = arith.cmpi ne, %1, %c0_i32_0 : i32
    scf.if %2 {
      %c0_13 = arith.constant 0 : index
      %c0_14 = arith.constant 0 : index
      %18 = vector.load %arg2[%c0_13, %c0_14] : memref<8x128xf32, #tpu.memory_space<vmem>>, vector<8x128xf32>
      %19 = arith.truncf %18 : vector<8x128xf32> to vector<8x128xbf16>
      %c0_15 = arith.constant 0 : index
      %c0_16 = arith.constant 0 : index
      %20 = vector.load %arg3[%c0_15, %c0_16] : memref<128x128xbf16, #tpu.memory_space<vmem>>, vector<128x128xbf16>
      %cst_17 = arith.constant dense<0.000000e+00> : vector<8x128xf32>
      %21 = tpu.matmul %19, %20, %cst_17 {dimension_numbers = #tpu.dot_dimension_numbers<[1], [0], [0], [1], [0, 0, 1, 1], [], []>} : vector<8x128xbf16>, vector<128x128xbf16>, vector<8x128xf32> -> vector<8x128xf32>
      %c0_18 = arith.constant 0 : index
      %c0_19 = arith.constant 0 : index
      %22 = vector.load %arg4[%c0_18, %c0_19] : memref<1x128xf32, #tpu.memory_space<vmem>>, vector<1x128xf32>
      %23 = vector.broadcast %22 : vector<1x128xf32> to vector<8x128xf32>
      %24 = arith.addf %21, %23 : vector<8x128xf32>
      %cst_20 = arith.constant 0.000000e+00 : f32
      %25 = vector.broadcast %cst_20 : f32 to vector<8x128xf32>
      %26 = arith.maximumf %24, %25 : vector<8x128xf32>
      %c0_21 = arith.constant 0 : index
      %c0_22 = arith.constant 0 : index
      %27 = vector.load %arg10[%c0_21, %c0_22] : memref<8x128xf32, #tpu.memory_space<vmem>>, vector<8x128xf32>
      tpu.vector_store %arg10[%c0_21, %c0_22], %26 {strides = array<i32>} : memref<8x128xf32, #tpu.memory_space<vmem>>, vector<8x128xf32>,
    } else {
    }
    %c0 = arith.constant 0 : index
    %c0_1 = arith.constant 0 : index
    %3 = vector.load %arg10[%c0, %c0_1] : memref<8x128xf32, #tpu.memory_space<vmem>>, vector<8x128xf32>
    %4 = arith.truncf %3 : vector<8x128xf32> to vector<8x128xbf16>
    %c0_2 = arith.constant 0 : index
    %c0_3 = arith.constant 0 : index
    %c0_4 = arith.constant 0 : index
    %5 = vector.load %arg5[%c0_2, %c0_3, %c0_4] : memref<1x128x128xbf16, #tpu.memory_space<vmem>>, vector<1x128x128xbf16>
    %6 = vector.shape_cast %5 : vector<1x128x128xbf16> to vector<128x128xbf16>
    %cst = arith.constant dense<0.000000e+00> : vector<8x128xf32>
    %7 = tpu.matmul %4, %6, %cst {dimension_numbers = #tpu.dot_dimension_numbers<[1], [0], [0], [1], [0, 0, 1, 1], [], []>} : vector<8x128xbf16>, vector<128x128xbf16>, vector<8x128xf32> -> vector<8x128xf32>
    %c0_5 = arith.constant 0 : index
    %c0_6 = arith.constant 0 : index
    %c0_7 = arith.constant 0 : index
    %8 = vector.load %arg6[%c0_5, %c0_6, %c0_7] : memref<1x1x128xf32, #tpu.memory_space<vmem>>, vector<1x1x128xf32>
    %9 = vector.shape_cast %8 : vector<1x1x128xf32> to vector<1x128xf32>
    %10 = vector.broadcast %9 : vector<1x128xf32> to vector<8x128xf32>
    %11 = arith.addf %7, %10 : vector<8x128xf32>
    %cst_8 = arith.constant 0.000000e+00 : f32
    %12 = vector.broadcast %cst_8 : f32 to vector<8x128xf32>
    %13 = arith.maximumf %11, %12 : vector<8x128xf32>
    %c0_9 = arith.constant 0 : index
    %c0_10 = arith.constant 0 : index
    %14 = vector.load %arg10[%c0_9, %c0_10] : memref<8x128xf32, #tpu.memory_space<vmem>>, vector<8x128xf32>
    tpu.vector_store %arg10[%c0_9, %c0_10], %13 {strides = array<i32>} : memref<8x128xf32, #tpu.memory_space<vmem>>, vector<8x128xf32>,
    %c0_i32_11 = arith.constant 0 : i32
    %15 = arith.cmpi eq, %arg1, %c0_i32_11 : i32
    %16 = arith.extui %15 : i1 to i32
    %c0_i32_12 = arith.constant 0 : i32
    %17 = arith.cmpi ne, %16, %c0_i32_12 : i32
    scf.if %17 {
      %c0_13 = arith.constant 0 : index
      %c0_14 = arith.constant 0 : index
      %18 = vector.load %arg10[%c0_13, %c0_14] : memref<8x128xf32, #tpu.memory_space<vmem>>, vector<8x128xf32>
      %19 = arith.truncf %18 : vector<8x128xf32> to vector<8x128xbf16>
      %c0_15 = arith.constant 0 : index
      %c0_16 = arith.constant 0 : index
      %20 = vector.load %arg7[%c0_15, %c0_16] : memref<128x128xbf16, #tpu.memory_space<vmem>>, vector<128x128xbf16>
      %cst_17 = arith.constant dense<0.000000e+00> : vector<8x128xf32>
      %21 = tpu.matmul %19, %20, %cst_17 {dimension_numbers = #tpu.dot_dimension_numbers<[1], [0], [0], [1], [0, 0, 1, 1], [], []>} : vector<8x128xbf16>, vector<128x128xbf16>, vector<8x128xf32> -> vector<8x128xf32>
      %c0_18 = arith.constant 0 : index
      %c0_19 = arith.constant 0 : index
      %22 = vector.load %arg8[%c0_18, %c0_19] : memref<1x128xf32, #tpu.memory_space<vmem>>, vector<1x128xf32>
      %23 = vector.broadcast %22 : vector<1x128xf32> to vector<8x128xf32>
      %24 = arith.addf %21, %23 : vector<8x128xf32>
      %c0_20 = arith.constant 0 : index
      %c0_21 = arith.constant 0 : index
      %25 = vector.load %arg9[%c0_20, %c0_21] : memref<8x128xf32, #tpu.memory_space<vmem>>, vector<8x128xf32>
      tpu.vector_store %arg9[%c0_20, %c0_21], %24 {strides = array<i32>} : memref<8x128xf32, #tpu.memory_space<vmem>>, vector<8x128xf32>,
    } else {
    }
    return
  }
  func.func @transform_0(%arg0: i32, %arg1: i32) -> (i32, i32) {
    %c0_i32 = arith.constant 0 : i32
    %c0_i32_0 = arith.constant 0 : i32
    return %arg0, %c0_i32 : i32, i32
  }
  func.func @transform_1(%arg0: i32, %arg1: i32) -> (i32, i32) {
    %c0_i32 = arith.constant 0 : i32
    %c0_i32_0 = arith.constant 0 : i32
    %c0_i32_1 = arith.constant 0 : i32
    return %c0_i32, %c0_i32_0 : i32, i32
  }
  func.func @transform_2(%arg0: i32, %arg1: i32) -> (i32, i32) {
    %c0_i32 = arith.constant 0 : i32
    %c0_i32_0 = arith.constant 0 : i32
    %c0_i32_1 = arith.constant 0 : i32
    return %c0_i32, %c0_i32_0 : i32, i32
  }
  func.func @transform_3(%arg0: i32, %arg1: i32) -> (i32, i32, i32) {
    %c0_i32 = arith.constant 0 : i32
    %c0_i32_0 = arith.constant 0 : i32
    %c0_i32_1 = arith.constant 0 : i32
    return %arg1, %c0_i32, %c0_i32_0 : i32, i32, i32
  }
  func.func @transform_4(%arg0: i32, %arg1: i32) -> (i32, i32, i32) {
    %c0_i32 = arith.constant 0 : i32
    %c0_i32_0 = arith.constant 0 : i32
    %c0_i32_1 = arith.constant 0 : i32
    return %arg1, %c0_i32, %c0_i32_0 : i32, i32, i32
  }
  func.func @transform_5(%arg0: i32, %arg1: i32) -> (i32, i32) {
    %c0_i32 = arith.constant 0 : i32
    %c0_i32_0 = arith.constant 0 : i32
    %c0_i32_1 = arith.constant 0 : i32
    return %c0_i32, %c0_i32_0 : i32, i32
  }
  func.func @transform_6(%arg0: i32, %arg1: i32) -> (i32, i32) {
    %c0_i32 = arith.constant 0 : i32
    %c0_i32_0 = arith.constant 0 : i32
    %c0_i32_1 = arith.constant 0 : i32
    return %c0_i32, %c0_i32_0 : i32, i32
  }
  func.func @transform_7(%arg0: i32, %arg1: i32) -> (i32, i32) {
    %c0_i32 = arith.constant 0 : i32
    %c0_i32_0 = arith.constant 0 : i32
    return %arg0, %c0_i32 : i32, i32
  }
}

</mosaic_0001>

<bundles_post_ra>
// kernel: nn_classifier_forward.1
= control target key start
LH: loop header
LB: loop body
LE: loop exit
PB: predicated region body
PF: predicated region fallthrough
CT: control target
= control target key end

     0   :  { %v522_v0 = vmov 0.0   ;;  %vm523_vm0 = vmmov 0   ;;  %s681_s1 = inlined_call_operand.vmem [shape: bf16[128,128], index: 1, kind: input, shape index: {}]   ;;  %s682_s3 = inlined_call_operand.vmem [shape: bf16[1,128,128], index: 3, kind: input, shape index: {}]   ;;  %s683_s0 = inlined_call_operand.vmem [shape: f32[8,128], index: 0, kind: input, shape index: {}]   ;;  %s684_s5 = inlined_call_operand.vmem [shape: bf16[128,128], index: 5, kind: input, shape index: {}]   ;;  %s685_s2 = inlined_call_operand.vmem [shape: f32[1,128], index: 2, kind: input, shape index: {}]   ;;  %s686_s4 = inlined_call_operand.vmem [shape: f32[1,1,128], index: 4, kind: input, shape index: {}]   ;;  %s687_s6 = inlined_call_operand.vmem [shape: f32[1,128], index: 6, kind: input, shape index: {}]   ;;  %s688_s7 = inlined_call_operand.vmem [shape: f32[8,128], index: 7, kind: output, shape index: {}]  }
   0x1   :  { %436 = vmatprep.subr.bf16.mxu0 %v522_v0  ;;  %v498_v1 = vld [vmem:[%s681_s1] sm:$0xff]   ;;  %452 = vmatprep.mubr.msk.bf16.mxu0 %vm523_vm0, %v522_v0  ;;  %v499_v2 = vld [vmem:[%s681_s1 + $0x8] sm:$0xff]   ;;  %v500_v3 = vld [vmem:[%s681_s1 + $0x10] sm:$0xff]  }
   0x2   :  { %456 = vmatprep.subr.bf16.mxu1 %v522_v0  ;;  %472 = vmatprep.mubr.msk.bf16.mxu1 %vm523_vm0, %v522_v0  ;;  %v506_v4 = vld [vmem:[%s682_s3] sm:$0xff]   ;;  %v501_v5 = vld [vmem:[%s681_s1 + $0x18] sm:$0xff]   ;;  %v507_v6 = vld [vmem:[%s682_s3 + $0x8] sm:$0xff]  }
   0x3   :  { %437 = vmatpush3.bf16.msra.mxu0 %v498_v1  ;;  %457 = vmatpush3.bf16.msra.mxu1 %v506_v4  ;;  %v502_v7 = vld [vmem:[%s681_s1 + $0x20] sm:$0xff]   ;;  %v508_v8 = vld [vmem:[%s682_s3 + $0x10] sm:$0xff]   ;;  %v503_v9 = vld [vmem:[%s681_s1 + $0x28] sm:$0xff]  }
   0x4   :  { %438 = vmatprep.subr.bf16.mxu0 %v522_v0  ;;  %458 = vmatprep.subr.bf16.mxu1 %v522_v0  ;;  %v509_v10 = vld [vmem:[%s682_s3 + $0x18] sm:$0xff]   ;;  %v504_v11 = vld [vmem:[%s681_s1 + $0x30] sm:$0xff]   ;;  %v510_v12 = vld [vmem:[%s682_s3 + $0x20] sm:$0xff]  }
   0x5   :  { %v505_v13 = vld [vmem:[%s681_s1 + $0x38] sm:$0xff]   ;;  %v31_v14 = vld [vmem:[%s683_s0] sm:$0xff]  ;;  %v511_v15 = vld [vmem:[%s682_s3 + $0x28] sm:$0xff]  }
   0x6   :  { %v32_v16 = vpack.c.bf16 %v31_v14, %v31_v14  ;;  %v512_v17 = vld [vmem:[%s682_s3 + $0x30] sm:$0xff]   ;;  %v513_v18 = vld [vmem:[%s682_s3 + $0x38] sm:$0xff]   ;;  %v514_v19 = vld [vmem:[%s684_s5] sm:$0xff]  }
   0x7   :  { %439 = vmatpush3.bf16.msra.mxu0 %v499_v2  ;;  %459 = vmatpush3.bf16.msra.mxu1 %v507_v6  ;;  %v515_v20 = vld [vmem:[%s684_s5 + $0x8] sm:$0xff]   ;;  %v516_v21 = vld [vmem:[%s684_s5 + $0x10] sm:$0xff]   ;;  %v517_v22 = vld [vmem:[%s684_s5 + $0x18] sm:$0xff]  }
   0x8   :  { %440 = vmatprep.subr.bf16.mxu0 %v522_v0  ;;  %460 = vmatprep.subr.bf16.mxu1 %v522_v0  ;;  %v518_v23 = vld [vmem:[%s684_s5 + $0x20] sm:$0xff]   ;;  %v519_v24 = vld [vmem:[%s684_s5 + $0x28] sm:$0xff]   ;;  %v520_v33 = vld [vmem:[%s684_s5 + $0x30] sm:$0xff]  }
   0x9   :  { %v382_v25 = vld [vmem:[%s685_s2] ss:$0 sm:$0xff]  ;;  %v521_v34 = vld [vmem:[%s684_s5 + $0x38] sm:$0xff]  }
   0xa   :  { %v391_v35 = vld [vmem:[%s686_s4] ss:$0 sm:$0xff] }
   0xb   :  { %441 = vmatpush3.bf16.msra.mxu0 %v500_v3  ;;  %461 = vmatpush3.bf16.msra.mxu1 %v508_v8  ;;  %v400_v43 = vld [vmem:[%s687_s6] ss:$0 sm:$0xff] }
   0xc   :  { %442 = vmatprep.subr.bf16.mxu0 %v522_v0  ;;  %462 = vmatprep.subr.bf16.mxu1 %v522_v0 }
   0xf   :  { %443 = vmatpush3.bf16.msra.mxu0 %v501_v5  ;;  %463 = vmatpush3.bf16.msra.mxu1 %v509_v10 }
  0x10   :  { %444 = vmatprep.subr.bf16.mxu0 %v522_v0  ;;  %464 = vmatprep.subr.bf16.mxu1 %v522_v0 }
  0x13   :  { %445 = vmatpush3.bf16.msra.mxu0 %v502_v7  ;;  %465 = vmatpush3.bf16.msra.mxu1 %v510_v12 }
  0x14   :  { %446 = vmatprep.subr.bf16.mxu0 %v522_v0  ;;  %466 = vmatprep.subr.bf16.mxu1 %v522_v0 }
  0x17   :  { %447 = vmatpush3.bf16.msra.mxu0 %v503_v9  ;;  %467 = vmatpush3.bf16.msra.mxu1 %v511_v15 }
  0x18   :  { %448 = vmatprep.subr.bf16.mxu0 %v522_v0  ;;  %468 = vmatprep.subr.bf16.mxu1 %v522_v0 }
  0x1b   :  { %449 = vmatpush3.bf16.msra.mxu0 %v504_v11  ;;  %469 = vmatpush3.bf16.msra.mxu1 %v512_v17 }
  0x1c   :  { %450 = vmatprep.subr.bf16.mxu0 %v522_v0  ;;  %470 = vmatprep.subr.bf16.mxu1 %v522_v0 }
  0x1f   :  { %451 = vmatpush3.bf16.msra.mxu0 %v505_v13  ;;  %471 = vmatpush3.bf16.msra.mxu1 %v513_v18 }
  0x20   :  { %476 = vmatprep.subr.bf16.mxu0 %v522_v0 }
  0x22   :  { %453 = vmatmul.mubr.bf16.vlgmr.msra.gmra.mrb[0].mxu0 %v32_v16 }
  0x23   :  { %492 = vmatprep.mubr.msk.bf16.mxu0 %vm523_vm0, %v522_v0  ;;  %477 = vmatpush3.bf16.msra.mxu0 %v514_v19 }
  0x24   :  { %478 = vmatprep.subr.bf16.mxu0 %v522_v0 }
  0x27   :  { %479 = vmatpush3.bf16.msra.mxu0 %v515_v20 }
  0x28   :  { %480 = vmatprep.subr.bf16.mxu0 %v522_v0 }
  0x2b   :  { %481 = vmatpush3.bf16.msra.mxu0 %v516_v21 }
  0x2c   :  { %482 = vmatprep.subr.bf16.mxu0 %v522_v0 }
  0x2f   :  { %483 = vmatpush3.bf16.msra.mxu0 %v517_v22 }
  0x30   :  { %484 = vmatprep.subr.bf16.mxu0 %v522_v0 }
  0x33   :  { %485 = vmatpush3.bf16.msra.mxu0 %v518_v23 }
  0x34   :  { %486 = vmatprep.subr.bf16.mxu0 %v522_v0 }
  0x37   :  { %487 = vmatpush3.bf16.msra.mxu0 %v519_v24 }
  0x38   :  { %488 = vmatprep.subr.bf16.mxu0 %v522_v0 }
  0x3b   :  { %489 = vmatpush3.bf16.msra.mxu0 %v520_v33 }
  0x3c   :  { %490 = vmatprep.subr.bf16.mxu0 %v522_v0 }
  0x3f   :  { %491 = vmatpush3.bf16.msra.mxu0 %v521_v34 }
  0xf5   :  { %v138_v26 = vpop.f32.mrb[0].mxu0 }
  0xf6   :  { %v139_v27 = vadd.f32 %v382_v25, %v138_v26  ;;  %v454_v28 = vpop.f32.mrb[1].mxu0 }
  0xf7   :  { %v141_v29 = vpop.f32.mrb[2].mxu0 }
  0xf8   :  { %v144_v30 = vmax.f32 %v139_v27, 0.0  ;;  %v455_v31 = vpop.f32.mrb[3].mxu0 }
  0xfa   :  { %v147_v32 = vpack.c.bf16 %v144_v30, %v144_v30 }
  0xfc   :  { %473 = vmatmul.mubr.bf16.vlgmr.msra.gmra.mrb[0].mxu1 %v147_v32 }
 0x1cf   :  { %v253_v36 = vpop.f32.mrb[0].mxu1 }
 0x1d0   :  { %v254_v37 = vadd.f32 %v391_v35, %v253_v36  ;;  %v474_v38 = vpop.f32.mrb[1].mxu1 }
 0x1d1   :  { %v256_v39 = vpop.f32.mrb[2].mxu1 }
 0x1d2   :  { %v259_v40 = vmax.f32 %v254_v37, 0.0  ;;  %v475_v41 = vpop.f32.mrb[3].mxu1 }
 0x1d4   :  { %v265_v42 = vpack.c.bf16 %v259_v40, %v259_v40 }
 0x1d6   :  { %493 = vmatmul.mubr.bf16.vlgmr.msra.gmra.mrb[4].mxu0 %v265_v42 }
 0x2a9   :  { %v371_v44 = vpop.f32.mrb[4].mxu0 }
 0x2aa   :  { %v372_v45 = vadd.f32 %v400_v43, %v371_v44  ;;  %v494_v46 = vpop.f32.mrb[5].mxu0 }
 0x2ab   :  { %v374_v47 = vpop.f32.mrb[6].mxu0 }
 0x2ac   :  { %377 = vst [vmem:[%s688_s7] sm:$0xff] %v372_v45  ;;  %v495_v48 = vpop.f32.mrb[7].mxu0 }

</bundles_post_ra>
